<compile_context>
chip_gen: v7x
topology: tpu7x:2x2x1
jax: 0.10.0
libtpu: 0.0.40
codegen_flags: <defaults>
</compile_context>

<pallas_src>
from functools import partial

import numpy as np
import jax
import jax.numpy as jnp
from jax.experimental import pallas as pl
from jax.experimental.pallas import tpu as pltpu


# ----------------------------- Pallas kernel -------------------------------

def backbone_decoder_kernel(x_ref, w1_ref, b1_ref, w2_ref, b2_ref, out_ref):
    # Linear 1 on the MXU (bf16 x bf16 -> f32 accumulate).  Pooling matrix,
    # backbone gather and z_ref branch are already folded into w1 / b1.
    h = jnp.dot(x_ref[...], w1_ref[...],
                preferred_element_type=jnp.float32) + b1_ref[...]

    # ReLU
    h = jnp.maximum(h, 0.0)

    # LayerNorm(hidden), eps = 1e-5 (PyTorch default, biased variance), f32.
    # Affine (gamma/beta) folded into w2/b2.  Two *independent* reductions so
    # they can overlap; var = E[h^2] - mean^2 (clamped at 0 for safety; the
    # zero-padded batch rows give var == 0, which stays finite).
    inv_h = 1.0 / h.shape[-1]
    s1 = jnp.sum(h, axis=-1, keepdims=True)
    s2 = jnp.sum(h * h, axis=-1, keepdims=True)
    mean = s1 * inv_h
    var = jnp.maximum(s2 * inv_h - mean * mean, 0.0)
    hn = (h - mean) * jax.lax.rsqrt(var + 1e-5)

    # Final Linear -> [TB, out_pad] (lane dim padded to 128 multiple).
    out_ref[...] = jnp.dot(hn.astype(w2_ref.dtype), w2_ref[...],
                           preferred_element_type=jnp.float32) + b2_ref[...]


# --------------------------- Constant folding --------------------------------

def adaptive_pool_matrix(in_size, out_size):
    """Row-stochastic matrix implementing 1-D adaptive average pooling bins."""
    m = np.zeros((out_size, in_size), dtype=np.float32)
    for i in range(out_size):
        s = (i * in_size) // out_size
        e = -(-((i + 1) * in_size) // out_size)  # ceil
        m[i, s:e] = 1.0 / (e - s)
    return m


def _round_up(x, m):
    return ((x + m - 1) // m) * m


def fold_backbone_decoder_params(params, z_ref, *, num_total_atoms,
                                 backbone_indices, pooling_dim=(20, 4)):
    """One-time folding of everything activation-independent (exact algebra).

    Returns fused (w1, b1, w2, b2) ready for the kernel:
      * AdaptiveAvgPool2d((H, W)) as kron(Ph, Pw), fused into W1.
      * z_ref branch of Linear1 folded into b1.
      * Backbone gather folded into W1 by scattering its rows into a
        zero-padded [N*E, hidden] weight (kernel reads hno_latent directly).
      * LayerNorm affine folded into W2 / b2.
      * Weights cast to bf16; biases kept f32; output lane dim padded to 128.
    """
    H, W = pooling_dim
    pool_dim = H * W
    bb_idx = np.asarray(backbone_indices, dtype=np.int64)
    BC = len(bb_idx)
    N = num_total_atoms
    E = z_ref.shape[1]

    W1, b1, gamma, beta, W2, b2 = (params[k] for k in
                                   ("W1", "b1", "gamma", "beta", "W2", "b2"))
    hidden = W1.shape[0]
    out_dim = W2.shape[0]

    # AdaptiveAvgPool2d((H, W)) over [BC, E] as a matmul with kron(Ph, Pw).
    ph = adaptive_pool_matrix(BC, H)                                 # [H, BC]
    pw = adaptive_pool_matrix(E, W)                                  # [W, E]
    pcomb_t = jnp.asarray(np.kron(ph, pw).T)                         # [BC*E, H*W]

    # Split W1 columns into z_ref part and pooled part.
    W1r = W1.reshape(hidden, BC, E + pool_dim)
    w1z_t = W1r[:, :, :E].reshape(hidden, BC * E).T                  # [BC*E, hidden]
    w1p_t = W1r[:, :, E:].sum(axis=1).T                              # [pool_dim, hidden]

    # Fuse pooling into W1p:   bbf @ (Pcomb.T @ W1p.T)
    w1_fused_bb = pcomb_t @ w1p_t                                    # [BC*E, hidden]

    # Fold the backbone gather into W1: scatter rows into a [N*E, hidden]
    # zero matrix so the kernel consumes hno_latent.reshape(B, N*E) directly
    # (no HBM copy of the activations for the gather).
    rows = (bb_idx[:, None] * E + np.arange(E)[None, :]).reshape(-1)
    w1_full = jnp.zeros((N * E, hidden), jnp.float32).at[rows].set(w1_fused_bb)

    # Fold the z_ref branch (constant per parameter set) into the bias.
    zbb_flat = z_ref[bb_idx, :].reshape(1, BC * E)                   # [1, BC*E]
    b1_eff = (zbb_flat @ w1z_t + b1.reshape(1, hidden))              # [1, hidden]

    # Fold LayerNorm affine into the final Linear.
    w2_t_eff = gamma[:, None] * W2.T                                 # [hidden, out_dim]
    b2_eff = (beta @ W2.T + b2).reshape(1, out_dim)                  # [1, out_dim]

    # Pad the output lane dim to a multiple of 128 (lane-dense stores).
    out_pad = _round_up(out_dim, 128)
    w2_p = jnp.pad(w2_t_eff, ((0, 0), (0, out_pad - out_dim)))
    b2_p = jnp.pad(b2_eff, ((0, 0), (0, out_pad - out_dim)))

    fused = {
        "w1": w1_full.astype(jnp.bfloat16),
        "b1": b1_eff.astype(jnp.float32),
        "w2": w2_p.astype(jnp.bfloat16),
        "b2": b2_p.astype(jnp.float32),
    }
    return jax.tree_util.tree_map(jax.block_until_ready, fused)


# ------------------------------- Forward -------------------------------------

@partial(jax.jit, static_argnames=("num_total_atoms", "backbone_count"))
def backbone_decoder_apply(hno_latent, w1, b1, w2, b2, *,
                           num_total_atoms, backbone_count):
    K, hidden = w1.shape            # K = num_total_atoms * E
    out_pad = w2.shape[1]
    BtimesN, E = hno_latent.shape
    B = BtimesN // num_total_atoms
    assert K == num_total_atoms * E

    # Feed activations straight through (gather folded into w1); bf16 input.
    x_flat = hno_latent.reshape(B, K).astype(jnp.bfloat16)

    # Batch tiling: multiple-of-8 rows, cap 1024; prefer >= 2 tiles so both
    # TensorCores get work on v7x (single-TC chips are unaffected).
    B8 = _round_up(B, 8)
    TB = min(1024, B8)
    if B8 >= 16:
        TB = min(TB, _round_up((B8 + 1) // 2, 8))
    B_pad = _round_up(B, TB)
    if B_pad != B:
        x_flat = jnp.pad(x_flat, ((0, B_pad - B), (0, 0)))
    n_tiles = B_pad // TB

    # Weights/biases are pinned (index_map -> (0, 0) for every grid step); the
    # pipeliner skips re-fetching blocks whose index does not change.
    # TODO(synk): confirm via the Mosaic dump that no per-step weight DMA is
    # emitted; if it is, stage weights through scratch with one sync_copy.
    pinned = lambda shape: pl.BlockSpec(shape, lambda i: (0, 0))

    pred_flat = pl.pallas_call(
        backbone_decoder_kernel,
        out_shape=jax.ShapeDtypeStruct((B_pad, out_pad), jnp.float32),
        grid=(n_tiles,),
        in_specs=[
            pl.BlockSpec((TB, K), lambda i: (i, 0)),      # activations (tiled rows)
            pinned((K, hidden)),                          # fused W1 (bf16)
            pinned((1, hidden)),                          # fused b1 (f32)
            pinned((hidden, out_pad)),                    # fused/padded W2 (bf16)
            pinned((1, out_pad)),                         # fused/padded b2 (f32)
        ],
        out_specs=pl.BlockSpec((TB, out_pad), lambda i: (i, 0)),
        compiler_params=pltpu.CompilerParams(
            dimension_semantics=("parallel",)),
    )(x_flat, w1, b1, w2, b2)

    out_dim = backbone_count * 3
    return pred_flat[:B, :out_dim].reshape(B, backbone_count, 3)


def backbone_decoder_forward(hno_latent, z_ref, params, *, num_total_atoms,
                             backbone_indices, pooling_dim=(20, 4)):
    """Convenience wrapper: fold params (once) + apply.  For repeated calls
    with the same params/z_ref, call fold_backbone_decoder_params once and
    reuse the fused arrays."""
    fused = fold_backbone_decoder_params(
        params, z_ref, num_total_atoms=num_total_atoms,
        backbone_indices=backbone_indices, pooling_dim=pooling_dim)
    return backbone_decoder_apply(
        hno_latent, fused["w1"], fused["b1"], fused["w2"], fused["b2"],
        num_total_atoms=num_total_atoms,
        backbone_count=len(backbone_indices))


# ------------------------- Pure-JAX reference -------------------------------

def backbone_decoder_reference(hno_latent, z_ref, params, *, num_total_atoms,
                               backbone_indices, pooling_dim=(20, 4)):
    H, W = pooling_dim
    BC = len(backbone_indices)
    BtimesN, E = hno_latent.shape
    B = BtimesN // num_total_atoms
    W1, b1, gamma, beta, W2, b2 = (params[k] for k in
                                   ("W1", "b1", "gamma", "beta", "W2", "b2"))

    x = hno_latent.reshape(B, num_total_atoms, E)
    bb = x[:, np.asarray(backbone_indices), :]            # [B, BC, E]
    ph = jnp.asarray(adaptive_pool_matrix(BC, H))
    pw = jnp.asarray(adaptive_pool_matrix(E, W))
    pooled = jnp.einsum("hn,bne,we->bhw", ph, bb, pw).reshape(B, H * W)

    zb = z_ref[np.asarray(backbone_indices), :]            # [BC, E]
    zb_exp = jnp.broadcast_to(zb[None], (B, BC, E))
    pooled_exp = jnp.broadcast_to(pooled[:, None, :], (B, BC, H * W))
    combined = jnp.concatenate([zb_exp, pooled_exp], axis=-1)
    combined_flat = combined.reshape(B, BC * (E + H * W))

    h = combined_flat @ W1.T + b1
    h = jnp.maximum(h, 0.0)
    mean = h.mean(-1, keepdims=True)
    var = ((h - mean) ** 2).mean(-1, keepdims=True)
    h = (h - mean) / jnp.sqrt(var + 1e-5) * gamma + beta
    out = h @ W2.T + b2
    return out.reshape(B, BC, 3)


# --------------------------------- Main --------------------------------------

if __name__ == "__main__":
    num_total_atoms = 32
    E = 16
    pooling_dim = (20, 4)
    pool_dim = pooling_dim[0] * pooling_dim[1]
    backbone_indices = np.arange(0, 30, dtype=np.int32)[
        np.array([i for i in range(30) if i % 5 != 4])]   # 24 indices
    BC = len(backbone_indices)
    input_dim = BC * (E + pool_dim)
    hidden = 128
    output_dim = BC * 3

    key = jax.random.PRNGKey(0)
    k = jax.random.split(key, 8)
    z_ref = jax.random.normal(k[1], (num_total_atoms, E), jnp.float32)
    params = {
        "W1": jax.random.normal(k[2], (hidden, input_dim), jnp.float32) * 0.05,
        "b1": jax.random.normal(k[3], (hidden,), jnp.float32) * 0.05,
        "gamma": jnp.ones((hidden,), jnp.float32),
        "beta": jnp.zeros((hidden,), jnp.float32),
        "W2": jax.random.normal(k[4], (output_dim, hidden), jnp.float32) * 0.05,
        "b2": jax.random.normal(k[5], (output_dim,), jnp.float32) * 0.05,
    }

    # Constant folding hoisted out of the per-call path (done once).
    fused = fold_backbone_decoder_params(
        params, z_ref, num_total_atoms=num_total_atoms,
        backbone_indices=backbone_indices, pooling_dim=pooling_dim)

    # bf16 inputs/weights (f32 accumulation + f32 LayerNorm) vs f32 reference:
    # tolerance appropriate for bfloat16 matmuls.
    TOL = 2e-2

    for B in (2, 48):   # single-tile path and multi-tile / padded path
        hno_latent = jax.random.normal(
            jax.random.fold_in(k[0], B),
            (B * num_total_atoms, E), jnp.float32)

        pred = backbone_decoder_apply(
            hno_latent, fused["w1"], fused["b1"], fused["w2"], fused["b2"],
            num_total_atoms=num_total_atoms, backbone_count=BC)
        pred = jax.block_until_ready(pred)

        ref = backbone_decoder_reference(
            hno_latent, z_ref, params,
            num_total_atoms=num_total_atoms,
            backbone_indices=backbone_indices,
            pooling_dim=pooling_dim)
        ref = jax.block_until_ready(ref)

        assert pred.shape == (B, BC, 3), pred.shape
        np.testing.assert_allclose(np.asarray(pred), np.asarray(ref),
                                   rtol=TOL, atol=TOL)

    print("KERNEL_OK")
</pallas_src>

<mosaic_0001>
module attributes {stable_mosaic.version = 11 : i64} {
  func.func @backbone_decoder_kernel(%arg0: i32, %arg1: memref<8x512xbf16, #tpu.memory_space<vmem>>, %arg2: memref<512x128xbf16, #tpu.memory_space<vmem>>, %arg3: memref<1x128xf32, #tpu.memory_space<vmem>>, %arg4: memref<128x128xbf16, #tpu.memory_space<vmem>>, %arg5: memref<1x128xf32, #tpu.memory_space<vmem>>, %arg6: memref<8x128xf32, #tpu.memory_space<vmem>>) attributes {dimension_semantics = [#tpu.dimension_semantics<parallel>], iteration_bounds = array<i64: 1>, scalar_prefetch = 0 : i64, scratch_operands = 0 : i64, tpu.core_type = #tpu.core_type<tc>, window_params = [{transform_indices = @transform_0, window_bounds = array<i64: 8, 512>}, {pipeline_mode = #tpu.pipeline_mode<synchronous>, transform_indices = @transform_1, window_bounds = array<i64: 512, 128>}, {pipeline_mode = #tpu.pipeline_mode<synchronous>, transform_indices = @transform_2, window_bounds = array<i64: 1, 128>}, {pipeline_mode = #tpu.pipeline_mode<synchronous>, transform_indices = @transform_3, window_bounds = array<i64: 128, 128>}, {pipeline_mode = #tpu.pipeline_mode<synchronous>, transform_indices = @transform_4, window_bounds = array<i64: 1, 128>}, {transform_indices = @transform_5, window_bounds = array<i64: 8, 128>}]} {
    %c0 = arith.constant 0 : index
    %c0_0 = arith.constant 0 : index
    %0 = vector.load %arg1[%c0, %c0_0] : memref<8x512xbf16, #tpu.memory_space<vmem>>, vector<8x512xbf16>
    %c0_1 = arith.constant 0 : index
    %c0_2 = arith.constant 0 : index
    %1 = vector.load %arg2[%c0_1, %c0_2] : memref<512x128xbf16, #tpu.memory_space<vmem>>, vector<512x128xbf16>
    %cst = arith.constant dense<0.000000e+00> : vector<8x128xf32>
    %2 = tpu.matmul %0, %1, %cst {dimension_numbers = #tpu.dot_dimension_numbers<[1], [0], [0], [1], [0, 0, 1, 1], [], []>} : vector<8x512xbf16>, vector<512x128xbf16>, vector<8x128xf32> -> vector<8x128xf32>
    %c0_3 = arith.constant 0 : index
    %c0_4 = arith.constant 0 : index
    %3 = vector.load %arg3[%c0_3, %c0_4] : memref<1x128xf32, #tpu.memory_space<vmem>>, vector<1x128xf32>
    %4 = vector.broadcast %3 : vector<1x128xf32> to vector<8x128xf32>
    %5 = arith.addf %2, %4 : vector<8x128xf32>
    %cst_5 = arith.constant 0.000000e+00 : f32
    %6 = vector.broadcast %cst_5 : f32 to vector<8x128xf32>
    %7 = arith.maximumf %5, %6 : vector<8x128xf32>
    %cst_6 = arith.constant dense<0.000000e+00> : vector<8xf32>
    %8 = vector.multi_reduction <add>, %7, %cst_6 [1] : vector<8x128xf32> to vector<8xf32>
    %9 = vector.shape_cast %8 : vector<8xf32> to vector<8x1xf32>
    %10 = arith.mulf %7, %7 : vector<8x128xf32>
    %cst_7 = arith.constant dense<0.000000e+00> : vector<8xf32>
    %11 = vector.multi_reduction <add>, %10, %cst_7 [1] : vector<8x128xf32> to vector<8xf32>
    %12 = vector.shape_cast %11 : vector<8xf32> to vector<8x1xf32>
    %cst_8 = arith.constant 7.812500e-03 : f32
    %13 = vector.broadcast %cst_8 : f32 to vector<8x1xf32>
    %14 = arith.mulf %9, %13 : vector<8x1xf32>
    %cst_9 = arith.constant 7.812500e-03 : f32
    %15 = vector.broadcast %cst_9 : f32 to vector<8x1xf32>
    %16 = arith.mulf %12, %15 : vector<8x1xf32>
    %17 = arith.mulf %14, %14 : vector<8x1xf32>
    %18 = arith.subf %16, %17 : vector<8x1xf32>
    %cst_10 = arith.constant 0.000000e+00 : f32
    %19 = vector.broadcast %cst_10 : f32 to vector<8x1xf32>
    %20 = arith.maximumf %18, %19 : vector<8x1xf32>
    %21 = vector.broadcast %14 : vector<8x1xf32> to vector<8x128xf32>
    %22 = arith.subf %7, %21 : vector<8x128xf32>
    %cst_11 = arith.constant 9.99999974E-6 : f32
    %23 = vector.broadcast %cst_11 : f32 to vector<8x1xf32>
    %24 = arith.addf %20, %23 : vector<8x1xf32>
    %25 = math.rsqrt %24 : vector<8x1xf32>
    %26 = vector.broadcast %25 : vector<8x1xf32> to vector<8x128xf32>
    %27 = arith.mulf %22, %26 : vector<8x128xf32>
    %28 = arith.truncf %27 : vector<8x128xf32> to vector<8x128xbf16>
    %c0_12 = arith.constant 0 : index
    %c0_13 = arith.constant 0 : index
    %29 = vector.load %arg4[%c0_12, %c0_13] : memref<128x128xbf16, #tpu.memory_space<vmem>>, vector<128x128xbf16>
    %cst_14 = arith.constant dense<0.000000e+00> : vector<8x128xf32>
    %30 = tpu.matmul %28, %29, %cst_14 {dimension_numbers = #tpu.dot_dimension_numbers<[1], [0], [0], [1], [0, 0, 1, 1], [], []>} : vector<8x128xbf16>, vector<128x128xbf16>, vector<8x128xf32> -> vector<8x128xf32>
    %c0_15 = arith.constant 0 : index
    %c0_16 = arith.constant 0 : index
    %31 = vector.load %arg5[%c0_15, %c0_16] : memref<1x128xf32, #tpu.memory_space<vmem>>, vector<1x128xf32>
    %32 = vector.broadcast %31 : vector<1x128xf32> to vector<8x128xf32>
    %33 = arith.addf %30, %32 : vector<8x128xf32>
    %c0_17 = arith.constant 0 : index
    %c0_18 = arith.constant 0 : index
    %34 = vector.load %arg6[%c0_17, %c0_18] : memref<8x128xf32, #tpu.memory_space<vmem>>, vector<8x128xf32>
    tpu.vector_store %arg6[%c0_17, %c0_18], %33 {strides = array<i32>} : memref<8x128xf32, #tpu.memory_space<vmem>>, vector<8x128xf32>,
    return
  }
  func.func @transform_0(%arg0: i32) -> (i32, i32) {
    %c0_i32 = arith.constant 0 : i32
    %c0_i32_0 = arith.constant 0 : i32
    return %arg0, %c0_i32 : i32, i32
  }
  func.func @transform_1(%arg0: i32) -> (i32, i32) {
    %c0_i32 = arith.constant 0 : i32
    %c0_i32_0 = arith.constant 0 : i32
    %c0_i32_1 = arith.constant 0 : i32
    return %c0_i32, %c0_i32_0 : i32, i32
  }
  func.func @transform_2(%arg0: i32) -> (i32, i32) {
    %c0_i32 = arith.constant 0 : i32
    %c0_i32_0 = arith.constant 0 : i32
    %c0_i32_1 = arith.constant 0 : i32
    return %c0_i32, %c0_i32_0 : i32, i32
  }
  func.func @transform_3(%arg0: i32) -> (i32, i32) {
    %c0_i32 = arith.constant 0 : i32
    %c0_i32_0 = arith.constant 0 : i32
    %c0_i32_1 = arith.constant 0 : i32
    return %c0_i32, %c0_i32_0 : i32, i32
  }
  func.func @transform_4(%arg0: i32) -> (i32, i32) {
    %c0_i32 = arith.constant 0 : i32
    %c0_i32_0 = arith.constant 0 : i32
    %c0_i32_1 = arith.constant 0 : i32
    return %c0_i32, %c0_i32_0 : i32, i32
  }
  func.func @transform_5(%arg0: i32) -> (i32, i32) {
    %c0_i32 = arith.constant 0 : i32
    %c0_i32_0 = arith.constant 0 : i32
    return %arg0, %c0_i32 : i32, i32
  }
}

</mosaic_0001>

<bundles_post_ra>
// kernel: backbone_decoder_apply.1
= control target key start
LH: loop header
LB: loop body
LE: loop exit
PB: predicated region body
PF: predicated region fallthrough
CT: control target
= control target key end

     0   :  { %10 = vsyncpa [#allocation3], 0  ;;  %s721_s18 = smov [#allocation2]   ;;  %s807_s0 = inlined_call_operand.vmem [shape: bf16[8,512], index: 0, kind: input, shape index: {}]   ;;  %s808_s1 = inlined_call_operand.hbm [shape: bf16[512,128], index: 1, kind: input, shape index: {}]   ;;  %s809_s2 = inlined_call_operand.vmem [shape: f32[1,128], index: 2, kind: input, shape index: {}]   ;;  %s810_s3 = inlined_call_operand.vmem [shape: bf16[128,128], index: 3, kind: input, shape index: {}]   ;;  %s811_s4 = inlined_call_operand.vmem [shape: f32[1,128], index: 4, kind: input, shape index: {}]   ;;  %s812_s5 = inlined_call_operand.vmem [shape: f32[8,128], index: 5, kind: output, shape index: {}]  }
   0x1   :  { %s18_s19 = sshll.u32 %s721_s18, 4  ;;  %s697_s22 = scalar_lea.hbm %s808_s1, 4096  ;;  %s19_s19 = int_to_ptr.vmem [resolvable:$true] %s18_s19 }
   0x2   :  { %p698_p0 = scmp.ne.s32.totalorder %s808_s1, %s697_s22  ;;  %p701_p1 = scmp.lt.u32.totalorder %s697_s22, %s808_s1 }
   0x4   :  { %p703_p2 = pnand %p701_p1, %p698_p0 }
   0x6   :  { %706 = shalt.err (!%p703_p2)
}
   0x7   :  { %s707_s27 = scalar_lea.vmem %s19_s19, 4096  ;;  %p712_p4 = scmp.lt.s32.totalorder %s19_s19, %s19_s19 }
   0x8   :  { %p708_p3 = scmp.ne.s32.totalorder %s19_s19, %s707_s27  ;;  %p713_p5 = scmp.lt.s32.totalorder %s707_s27, %s707_s27 }
   0xa   :  { %p714_p6 = por %p713_p5, %p712_p4 }
   0xc   :  { %p715_p7 = pnand %p714_p6, %p708_p3 }
   0xe   :  { %718 = shalt.err (!%p715_p7)
}
   0xf   :  { %s722_s28 = smov 64   ;;  %s723_s29 = smov 4  }
  0x10   :  { %24 = dma.hbm_to_vmem [thread:$0]  %s808_s1, 4096, %s19_s19, [#allocation3], %s722_s28, %s722_s28, %s723_s29  }
  0x11   :  { %719 = dma.done.wait [#allocation3], 4096  }
  0x12   :  { %720 = vsyncadd [#allocation3], 4294963200  ;;  %v651_v0 = vld [vmem:[#allocation2 + $0x40] sm:$0xff]   ;;  %v655_v4 = vld [vmem:[#allocation2 + $0x48] sm:$0xff]   ;;  %v724_v39 = vmov 0.0   ;;  %vm725_vm0 = vmmov 0  }
  0x13   :  { %v652_v1 = vld [vmem:[#allocation2 + $0xc0] sm:$0xff]   ;;  %573 = vmatprep.subr.bf16.mxu0 %v651_v0  ;;  %v656_v5 = vld [vmem:[#allocation2 + $0xc8] sm:$0xff]   ;;  %v659_v8 = vld [vmem:[#allocation2 + $0x50] sm:$0xff]  }
  0x14   :  { %v653_v2 = vld [vmem:[#allocation2] sm:$0xff]   ;;  %595 = vmatprep.subr.bf16.mxu1 %v652_v1  ;;  %v657_v6 = vld [vmem:[#allocation2 + $0x8] sm:$0xff]   ;;  %v660_v9 = vld [vmem:[#allocation2 + $0xd0] sm:$0xff]  }
  0x15   :  { %v654_v3 = vld [vmem:[#allocation2 + $0x80] sm:$0xff]   ;;  %574 = vmatpush3.bf16.msra.mxu0 %v653_v2  ;;  %v658_v7 = vld [vmem:[#allocation2 + $0x88] sm:$0xff]   ;;  %v661_v10 = vld [vmem:[#allocation2 + $0x10] sm:$0xff]  }
  0x16   :  { %596 = vmatpush3.bf16.msra.mxu1 %v654_v3  ;;  %575 = vmatprep.subr.bf16.mxu0 %v655_v4  ;;  %v662_v11 = vld [vmem:[#allocation2 + $0x90] sm:$0xff]   ;;  %v663_v12 = vld [vmem:[#allocation2 + $0x58] sm:$0xff]   ;;  %v667_v16 = vld [vmem:[#allocation2 + $0x60] sm:$0xff]  }
  0x17   :  { %597 = vmatprep.subr.bf16.mxu1 %v656_v5  ;;  %v664_v13 = vld [vmem:[#allocation2 + $0xd8] sm:$0xff]   ;;  %v668_v17 = vld [vmem:[#allocation2 + $0xe0] sm:$0xff]   ;;  %v671_v20 = vld [vmem:[#allocation2 + $0x68] sm:$0xff]  }
  0x18   :  { %v665_v14 = vld [vmem:[#allocation2 + $0x18] sm:$0xff]   ;;  %v669_v18 = vld [vmem:[#allocation2 + $0x20] sm:$0xff]   ;;  %v672_v21 = vld [vmem:[#allocation2 + $0xe8] sm:$0xff]  }
  0x19   :  { %576 = vmatpush3.bf16.msra.mxu0 %v657_v6  ;;  %v666_v15 = vld [vmem:[#allocation2 + $0x98] sm:$0xff]   ;;  %v670_v19 = vld [vmem:[#allocation2 + $0xa0] sm:$0xff]   ;;  %v673_v22 = vld [vmem:[#allocation2 + $0x28] sm:$0xff]  }
  0x1a   :  { %598 = vmatpush3.bf16.msra.mxu1 %v658_v7  ;;  %577 = vmatprep.subr.bf16.mxu0 %v659_v8  ;;  %v674_v23 = vld [vmem:[#allocation2 + $0xa8] sm:$0xff]   ;;  %v675_v24 = vld [vmem:[#allocation2 + $0x70] sm:$0xff]   ;;  %v679_v28 = vld [vmem:[#allocation2 + $0x78] sm:$0xff]  }
  0x1b   :  { %599 = vmatprep.subr.bf16.mxu1 %v660_v9  ;;  %v676_v25 = vld [vmem:[#allocation2 + $0xf0] sm:$0xff]   ;;  %v680_v29 = vld [vmem:[#allocation2 + $0xf8] sm:$0xff]   ;;  %v35_v32 = vld [vmem:[%s807_s0] sm:$0xff] }
  0x1c   :  { %v677_v26 = vld [vmem:[#allocation2 + $0x30] sm:$0xff]   ;;  %v681_v30 = vld [vmem:[#allocation2 + $0x38] sm:$0xff]   ;;  %v36_v33 = vld [vmem:[%s807_s0 + $0x8] sm:$0xff]  ;;  %v528_v34 = vcombine.low %v35_v32, %v35_v32  ;;  %v529_v35 = vcombine.high %v35_v32, %v35_v32 }
  0x1d   :  { %578 = vmatpush3.bf16.msra.mxu0 %v661_v10  ;;  %v678_v27 = vld [vmem:[#allocation2 + $0xb0] sm:$0xff]   ;;  %v682_v31 = vld [vmem:[#allocation2 + $0xb8] sm:$0xff]   ;;  %v530_v36 = vcombine.low %v36_v33, %v36_v33  ;;  %v531_v37 = vcombine.high %v36_v33, %v36_v33  ;;  %v687_v38 = vld [vmem:[%s810_s3] sm:$0xff]  }
  0x1e   :  { %600 = vmatpush3.bf16.msra.mxu1 %v662_v11  ;;  %579 = vmatprep.subr.bf16.mxu0 %v663_v12  ;;  %v527_v42 = vld [vmem:[%s809_s2] ss:$0 sm:$0xff]  ;;  %v688_v55 = vld [vmem:[%s810_s3 + $0x8] sm:$0xff]   ;;  %v689_v56 = vld [vmem:[%s810_s3 + $0x10] sm:$0xff]  }
  0x1f   :  { %601 = vmatprep.subr.bf16.mxu1 %v664_v13  ;;  %346 = vmatprep.mubr.bf16.mxu0 %v529_v35  ;;  %v690_v57 = vld [vmem:[%s810_s3 + $0x18] sm:$0xff]   ;;  %v691_v58 = vld [vmem:[%s810_s3 + $0x20] sm:$0xff]   ;;  %v692_v59 = vld [vmem:[%s810_s3 + $0x28] sm:$0xff]  }
  0x20   :  { %386 = vmatprep.mubr.bf16.mxu1 %v531_v37  ;;  %v693_v60 = vld [vmem:[%s810_s3 + $0x30] sm:$0xff]   ;;  %v694_v61 = vld [vmem:[%s810_s3 + $0x38] sm:$0xff]   ;;  %v564_v10 = vld [vmem:[%s811_s4] ss:$0 sm:$0xff] }
  0x21   :  { %580 = vmatpush3.bf16.msra.mxu0 %v665_v14 }
  0x22   :  { %602 = vmatpush3.bf16.msra.mxu1 %v666_v15  ;;  %581 = vmatprep.subr.bf16.mxu0 %v667_v16 }
  0x23   :  { %603 = vmatprep.subr.bf16.mxu1 %v668_v17 }
  0x25   :  { %582 = vmatpush3.bf16.msra.mxu0 %v669_v18 }
  0x26   :  { %604 = vmatpush3.bf16.msra.mxu1 %v670_v19  ;;  %583 = vmatprep.subr.bf16.mxu0 %v671_v20 }
  0x27   :  { %605 = vmatprep.subr.bf16.mxu1 %v672_v21 }
  0x29   :  { %584 = vmatpush3.bf16.msra.mxu0 %v673_v22 }
  0x2a   :  { %606 = vmatpush3.bf16.msra.mxu1 %v674_v23  ;;  %585 = vmatprep.subr.bf16.mxu0 %v675_v24 }
  0x2b   :  { %607 = vmatprep.subr.bf16.mxu1 %v676_v25 }
  0x2d   :  { %586 = vmatpush3.bf16.msra.mxu0 %v677_v26 }
  0x2e   :  { %608 = vmatpush3.bf16.msra.mxu1 %v678_v27  ;;  %587 = vmatprep.subr.bf16.mxu0 %v679_v28 }
  0x2f   :  { %609 = vmatprep.subr.bf16.mxu1 %v680_v29 }
  0x31   :  { %588 = vmatpush3.bf16.msra.mxu0 %v681_v30 }
  0x32   :  { %610 = vmatpush3.bf16.msra.mxu1 %v682_v31  ;;  %626 = vmatprep.subr.bf16.mxu0 %v724_v39 }
  0x34   :  { %347 = vmatmul.mubr.bf16.vlgmr.msra.gmra.mrb[0].mxu0 %v528_v34 }
  0x35   :  { %387 = vmatmul.mubr.bf16.vlgmr.msra.gmra.mrb[0].mxu1 %v530_v36  ;;  %627 = vmatpush3.bf16.msra.mxu0 %v687_v38 }
  0x36   :  { %628 = vmatprep.subr.bf16.mxu0 %v724_v39  ;;  %642 = vmatprep.mubr.msk.bf16.mxu0 %vm725_vm0, %v724_v39 }
  0x39   :  { %629 = vmatpush3.bf16.msra.mxu0 %v688_v55 }
  0x3a   :  { %630 = vmatprep.subr.bf16.mxu0 %v724_v39 }
  0x3d   :  { %631 = vmatpush3.bf16.msra.mxu0 %v689_v56 }
  0x3e   :  { %632 = vmatprep.subr.bf16.mxu0 %v724_v39 }
  0x41   :  { %633 = vmatpush3.bf16.msra.mxu0 %v690_v57 }
  0x42   :  { %634 = vmatprep.subr.bf16.mxu0 %v724_v39 }
  0x45   :  { %635 = vmatpush3.bf16.msra.mxu0 %v691_v58 }
  0x46   :  { %636 = vmatprep.subr.bf16.mxu0 %v724_v39 }
  0x49   :  { %637 = vmatpush3.bf16.msra.mxu0 %v692_v59 }
  0x4a   :  { %638 = vmatprep.subr.bf16.mxu0 %v724_v39 }
  0x4d   :  { %639 = vmatpush3.bf16.msra.mxu0 %v693_v60 }
  0x4e   :  { %640 = vmatprep.subr.bf16.mxu0 %v724_v39 }
  0x51   :  { %641 = vmatpush3.bf16.msra.mxu0 %v694_v61 }
 0x107   :  { %v589_v40 = vpop.f32.mrb[0].mxu0 }
 0x108   :  { %v611_v41 = vpop.f32.mrb[0].mxu1  ;;  %v590_v43 = vpop.f32.mrb[1].mxu0 }
 0x109   :  { %v612_v44 = vpop.f32.mrb[1].mxu1  ;;  %v591_v45 = vadd.f32 %v590_v43, %v589_v40  ;;  %v592_v47 = vpop.f32.mrb[2].mxu0 }
 0x10a   :  { %v613_v46 = vadd.f32 %v612_v44, %v611_v41  ;;  %v614_v48 = vpop.f32.mrb[2].mxu1  ;;  %v593_v49 = vpop.f32.mrb[3].mxu0 }
 0x10b   :  { %v615_v50 = vpop.f32.mrb[3].mxu1  ;;  %v349_v51 = vadd.f32 %v591_v45, %v527_v42 }
 0x10d   :  { %v389_v52 = vadd.f32 %v613_v46, %v349_v51 }
 0x10f   :  { %v394_v53 = vmax.f32 %v389_v52, 0.0 }
 0x111   :  { %395 = vadd.xlane.f32.xlu0 %v394_v53  ;;  %v397_v54 = vmul.f32 %v394_v53, %v394_v53 }
 0x115   :  { %398 = vadd.xlane.f32.xlu0 %v397_v54 }
 0x19e   :  { %v396_v62 = vpop.xlane.xlu0 %395 }
 0x19f   :  { %v400_v63 = vmul.f32 0.0078125, %v396_v62 }
 0x1a1   :  { %v402_v1 = vmul.f32 %v400_v63, %v400_v63  ;;  %v405_v6 = vsub.f32 %v394_v53, %v400_v63 }
 0x1a2   :  { %v399_v0 = vpop.xlane.xlu0 %398 }
 0x1a3   :  { %v401_v2 = vmul.f32 0.0078125, %v399_v0 }
 0x1a5   :  { %v403_v3 = vsub.f32 %v401_v2, %v402_v1 }
 0x1a7   :  { %v404_v4 = vmax.f32 %v403_v3, 0.0 }
 0x1a9   :  { %v406_v5 = vadd.f32 1e-05, %v404_v4 }
 0x1ab   :  { %695 = vrsqrt.f32 %v406_v5 }
 0x1b5   :  { %v696_v7 = vpop.eup %695 }
 0x1b6   :  { %v408_v8 = vmul.f32 %v696_v7, %v405_v6 }
 0x1b8   :  { %v409_v9 = vpack.c.bf16 %v408_v8, %v408_v8 }
 0x1ba   :  { %643 = vmatmul.mubr.bf16.vlgmr.msra.gmra.mrb[4].mxu0 %v409_v9 }
 0x28d   :  { %v515_v11 = vpop.f32.mrb[4].mxu0 }
 0x28e   :  { %v516_v12 = vadd.f32 %v564_v10, %v515_v11  ;;  %v644_v13 = vpop.f32.mrb[5].mxu0 }
 0x28f   :  { %v518_v14 = vpop.f32.mrb[6].mxu0 }
 0x290   :  { %521 = vst [vmem:[%s812_s5] sm:$0xff] %v516_v12  ;;  %v645_v15 = vpop.f32.mrb[7].mxu0 }
 0x291   :  { %526 = vsyncpa [#allocation3], 1 }

</bundles_post_ra>
